<compile_context>
chip_gen: v5e
topology: v5e:2x2
jax: 0.10.0
libtpu: 0.0.40
codegen_flags: <defaults>
</compile_context>

<pallas_src>
import functools

import jax
import jax.numpy as jnp
from jax.experimental import pallas as pl
from jax.experimental.pallas import tpu as pltpu


def _cdiv(a, b):
    return (a + b - 1) // b


def _round_up(x, m):
    return _cdiv(x, m) * m


# ----------------------------------------------------------------------------
# Kernel: one lane tile of the fused (W1 | b1) GEMM.
#   x    : (B, L)     resident in VMEM (constant index_map -> fetched once)
#   w    : (L, TN)    streamed / double-buffered across the grid
#   bias : (1, d_pad) resident f32 (constant index_map -> fetched once),
#                     sliced in-kernel at the current 128-aligned lane offset
#   out  : (B, TN)
# ----------------------------------------------------------------------------
def _head_kernel(x_ref, w_ref, b_ref, out_ref, *, block_n):
    j = pl.program_id(0)
    acc = jnp.dot(x_ref[...], w_ref[...], preferred_element_type=jnp.float32)
    off = pl.multiple_of(j * block_n, 128)
    bias = b_ref[:, pl.ds(off, block_n)]          # (1, TN) f32, no per-step DMA
    out_ref[...] = (acc + bias).astype(out_ref.dtype)


def _choose_tiling(latent_dim, d_tot, w_itemsize, *, batch_hint,
                   vmem_budget_bytes, min_steps):
    """Pick (block_n, d_pad) from a VMEM budget; grid divides d_pad exactly."""
    n128 = _cdiv(d_tot, 128)                       # lane groups actually needed
    d_pad128 = n128 * 128
    # Conservative double-buffer accounting (bytes):
    fixed = 2 * batch_hint * latent_dim * w_itemsize + 2 * d_pad128 * 4
    per_lane = 2 * latent_dim * w_itemsize + 2 * batch_hint * 4
    avail = max(vmem_budget_bytes - fixed, per_lane * 128)
    max_cols = max(avail // (per_lane * 128), 1)   # max 128-col groups per tile
    # At least `min_steps` grid steps (v7x: 2 TCs) when there is enough width.
    steps = max(min(min_steps, n128), _cdiv(n128, max_cols))
    block_cols = _cdiv(n128, steps)
    block_n = block_cols * 128
    d_pad = steps * block_n                        # waste <= (steps-1) cols + <128 lanes
    return block_n, d_pad


def pack_head_params(w1_weight_t, w1_bias, b1_weight_t, b1_bias, *,
                     param_dtype=jnp.bfloat16, batch_hint=8,
                     vmem_budget_bytes=40 * 1024 * 1024, min_steps=2):
    """Fuses + pads the two Linear layers into one lane-dense GEMM operand.

    Args (PyTorch Linear weights pre-transposed to (in_features, out_features)):
      w1_weight_t: (L, Dw) with Dw = output_dim_in * output_dim_out
      w1_bias:     (1, Dw)
      b1_weight_t: (L, Db) with Db = output_dim_out
      b1_bias:     (1, Db)
      param_dtype: packed weight dtype (default bf16 -> halves HBM bytes; the
                   bias and the accumulator stay f32).  Use jnp.float32 for
                   bit-exact parity with the PyTorch module.
    Returns:
      (w_packed (L, d_pad) param_dtype, b_packed (1, d_pad) f32, block_n)
    """
    L, Dw = w1_weight_t.shape
    Db = b1_weight_t.shape[1]
    d_tot = Dw + Db
    w_itemsize = jnp.dtype(param_dtype).itemsize
    block_n, d_pad = _choose_tiling(L, d_tot, w_itemsize, batch_hint=batch_hint,
                                    vmem_budget_bytes=vmem_budget_bytes,
                                    min_steps=min_steps)

    w = jnp.concatenate([w1_weight_t, b1_weight_t], axis=1).astype(param_dtype)
    w = jnp.pad(w, ((0, 0), (0, d_pad - d_tot)))

    b = jnp.concatenate([w1_bias, b1_bias], axis=1).astype(jnp.float32)
    b = jnp.pad(b, ((0, 0), (0, d_pad - d_tot)))
    return w, b, block_n


def head_forward(x, w_packed, b_packed, output_dim_in, output_dim_out, block_n):
    """Runs the fused/tiled Pallas kernel and reshapes outputs to PyTorch conv.

    Returns (w, b) with shapes (B, output_dim_out, output_dim_in) and
    (B, output_dim_out, 1).
    """
    B, L = x.shape
    Lw, d_pad = w_packed.shape
    assert Lw == L and d_pad % block_n == 0
    Dw = output_dim_in * output_dim_out
    Db = output_dim_out
    assert Dw + Db <= d_pad

    out_dtype = x.dtype
    x_in = x.astype(w_packed.dtype)        # hoisted cast: once, not per grid step

    w_item = w_packed.dtype.itemsize
    x_item = x_in.dtype.itemsize
    # Actual double-buffered working set; cap vmem_limit at 48 MiB (v7x-safe).
    need = (2 * L * block_n * w_item       # weight double buffer
            + 2 * B * block_n * 4          # output double buffer
            + 2 * B * L * x_item           # resident x (conservative x2)
            + 2 * d_pad * 4)               # resident bias (conservative x2)
    vmem_limit = int(min(48 * 1024 * 1024, max(24 * 1024 * 1024, 2 * need)))

    grid = (d_pad // block_n,)
    out = pl.pallas_call(
        functools.partial(_head_kernel, block_n=block_n),
        out_shape=jax.ShapeDtypeStruct((B, d_pad), out_dtype),
        grid=grid,
        in_specs=[
            pl.BlockSpec((B, L), lambda j: (0, 0)),          # x resident
            pl.BlockSpec((L, block_n), lambda j: (0, j)),    # weight streamed
            pl.BlockSpec((1, d_pad), lambda j: (0, 0)),      # bias resident
        ],
        out_specs=pl.BlockSpec((B, block_n), lambda j: (0, j)),
        compiler_params=pltpu.CompilerParams(
            dimension_semantics=("parallel",),               # 2 TCs on v7x
            vmem_limit_bytes=vmem_limit,
        ),
        cost_estimate=pl.CostEstimate(
            flops=2 * B * L * d_pad,
            transcendentals=0,
            bytes_accessed=(w_packed.size * w_item + x_in.size * x_item
                            + b_packed.size * 4 + B * d_pad * out_dtype.itemsize),
        ),
    )(x_in, w_packed, b_packed)

    # Negligible at small B; for very large B emit two kernel outputs instead.
    w_flat = out[:, :Dw]
    b_flat = out[:, Dw:Dw + Db]
    w = w_flat.reshape(B, output_dim_out, output_dim_in)
    b = b_flat.reshape(B, output_dim_out, 1)
    return w, b


def init_head_params(key, latent_dim, output_dim_in, output_dim_out, stddev):
    """Mirrors Head.init_layers: uniform(-stddev, stddev) weights, zero biases.

    PyTorch Linear weight is (out_features, in_features); we store the
    transpose (in_features, out_features) so the kernel does x @ W.
    """
    k1, k2 = jax.random.split(key)
    w1_weight_t = jax.random.uniform(
        k1, (latent_dim, output_dim_in * output_dim_out),
        minval=-stddev, maxval=stddev, dtype=jnp.float32)
    b1_weight_t = jax.random.uniform(
        k2, (latent_dim, output_dim_out),
        minval=-stddev, maxval=stddev, dtype=jnp.float32)
    w1_bias = jnp.zeros((1, output_dim_in * output_dim_out), jnp.float32)
    b1_bias = jnp.zeros((1, output_dim_out), jnp.float32)
    return w1_weight_t, w1_bias, b1_weight_t, b1_bias


if __name__ == "__main__":
    batch = 2
    latent_dim = 32
    output_dim_in = 16
    output_dim_out = 8
    stddev = 0.05

    key = jax.random.PRNGKey(0)
    k_x, k_p = jax.random.split(key)

    x = jax.random.normal(k_x, (batch, latent_dim), dtype=jnp.float32)
    w1_weight_t, w1_bias, b1_weight_t, b1_bias = init_head_params(
        k_p, latent_dim, output_dim_in, output_dim_out, stddev)

    w_ref_f32 = (x @ w1_weight_t + w1_bias).reshape(batch, output_dim_out, output_dim_in)
    b_ref_f32 = (x @ b1_weight_t + b1_bias).reshape(batch, output_dim_out, 1)

    # ---------- f32 params: exact parity with the PyTorch module math --------
    w_packed, b_packed, block_n = pack_head_params(
        w1_weight_t, w1_bias, b1_weight_t, b1_bias, param_dtype=jnp.float32)
    fwd = jax.jit(functools.partial(
        head_forward, output_dim_in=output_dim_in,
        output_dim_out=output_dim_out, block_n=block_n))
    w, b = fwd(x, w_packed, b_packed)
    jax.block_until_ready((w, b))
    assert w.shape == (batch, output_dim_out, output_dim_in)
    assert b.shape == (batch, output_dim_out, 1)
    assert jnp.allclose(w, w_ref_f32, atol=1e-5), "w mismatch (f32)"
    assert jnp.allclose(b, b_ref_f32, atol=1e-5), "b mismatch (f32)"

    # ---------- default bf16 weights (half the HBM bytes, f32 accumulation) --
    w_packed_bf, b_packed_bf, block_n_bf = pack_head_params(
        w1_weight_t, w1_bias, b1_weight_t, b1_bias)          # bf16 default
    fwd_bf = jax.jit(functools.partial(
        head_forward, output_dim_in=output_dim_in,
        output_dim_out=output_dim_out, block_n=block_n_bf))
    w_bf, b_bf = fwd_bf(x, w_packed_bf, b_packed_bf)
    jax.block_until_ready((w_bf, b_bf))

    x_b = x.astype(jnp.bfloat16).astype(jnp.float32)
    w1_b = w1_weight_t.astype(jnp.bfloat16).astype(jnp.float32)
    b1_b = b1_weight_t.astype(jnp.bfloat16).astype(jnp.float32)
    w_ref_bf = (x_b @ w1_b + w1_bias).reshape(batch, output_dim_out, output_dim_in)
    b_ref_bf = (x_b @ b1_b + b1_bias).reshape(batch, output_dim_out, 1)
    assert jnp.allclose(w_bf, w_ref_bf, atol=1e-4), "w mismatch (bf16)"
    assert jnp.allclose(b_bf, b_ref_bf, atol=1e-4), "b mismatch (bf16)"
    # bf16 output stays close to the f32 module (bounded by bf16 rounding):
    assert jnp.allclose(w_bf, w_ref_f32, atol=5e-3), "w drift (bf16 vs f32)"

    # ---------- larger head: exercises the multi-tile streaming grid ---------
    big_in, big_out = 96, 64                 # Dw = 6144, d_tot = 6208 -> 49 lane groups
    w1w2, w1b2, b1w2, b1b2 = init_head_params(
        jax.random.PRNGKey(1), latent_dim, big_in, big_out, stddev)
    wp2, bp2, bn2 = pack_head_params(w1w2, w1b2, b1w2, b1b2)  # bf16 default, 2 tiles
    fwd2 = jax.jit(functools.partial(
        head_forward, output_dim_in=big_in, output_dim_out=big_out, block_n=bn2))
    w2, b2 = fwd2(x, wp2, bp2)
    jax.block_until_ready((w2, b2))
    w2_ref = (x_b @ w1w2.astype(jnp.bfloat16).astype(jnp.float32) + w1b2
              ).reshape(batch, big_out, big_in)
    b2_ref = (x_b @ b1w2.astype(jnp.bfloat16).astype(jnp.float32) + b1b2
              ).reshape(batch, big_out, 1)
    assert jnp.allclose(w2, w2_ref, atol=1e-4), "w mismatch (big, 2 tiles)"
    assert jnp.allclose(b2, b2_ref, atol=1e-4), "b mismatch (big, 2 tiles)"

    # ---------- tight VMEM budget: forces a longer streaming grid ------------
    wp3, bp3, bn3 = pack_head_params(w1w2, w1b2, b1w2, b1b2,
                                     vmem_budget_bytes=256 * 1024)
    fwd3 = jax.jit(functools.partial(
        head_forward, output_dim_in=big_in, output_dim_out=big_out, block_n=bn3))
    w3, b3 = fwd3(x, wp3, bp3)
    jax.block_until_ready((w3, b3))
    assert jnp.allclose(w3, w2_ref, atol=1e-4), "w mismatch (big, many tiles)"
    assert jnp.allclose(b3, b2_ref, atol=1e-4), "b mismatch (big, many tiles)"

    print("KERNEL_OK")
</pallas_src>

<mosaic_0001>
module attributes {stable_mosaic.version = 11 : i64} {
  func.func @_head_kernel(%arg0: i32, %arg1: memref<2x32xf32, #tpu.memory_space<vmem>>, %arg2: memref<32x128xf32, #tpu.memory_space<vmem>>, %arg3: memref<1x256xf32, #tpu.memory_space<vmem>>, %arg4: memref<2x128xf32, #tpu.memory_space<vmem>>) attributes {dimension_semantics = [#tpu.dimension_semantics<parallel>], iteration_bounds = array<i64: 2>, scalar_prefetch = 0 : i64, scratch_operands = 0 : i64, tpu.core_type = #tpu.core_type<tc>, window_params = [{pipeline_mode = #tpu.pipeline_mode<synchronous>, transform_indices = @transform_0, window_bounds = array<i64: 2, 32>}, {transform_indices = @transform_1, window_bounds = array<i64: 32, 128>}, {pipeline_mode = #tpu.pipeline_mode<synchronous>, transform_indices = @transform_2, window_bounds = array<i64: 1, 256>}, {transform_indices = @transform_3, window_bounds = array<i64: 2, 128>}]} {
    %c0 = arith.constant 0 : index
    %c0_0 = arith.constant 0 : index
    %0 = vector.load %arg1[%c0, %c0_0] : memref<2x32xf32, #tpu.memory_space<vmem>>, vector<2x32xf32>
    %c0_1 = arith.constant 0 : index
    %c0_2 = arith.constant 0 : index
    %1 = vector.load %arg2[%c0_1, %c0_2] : memref<32x128xf32, #tpu.memory_space<vmem>>, vector<32x128xf32>
    %cst = arith.constant dense<0.000000e+00> : vector<2x128xf32>
    %2 = tpu.matmul %0, %1, %cst {dimension_numbers = #tpu.dot_dimension_numbers<[1], [0], [0], [1], [0, 0, 1, 1], [], []>} : vector<2x32xf32>, vector<32x128xf32>, vector<2x128xf32> -> vector<2x128xf32>
    %c128_i32 = arith.constant 128 : i32
    %3 = arith.muli %arg0, %c128_i32 : i32
    %4 = tpu.assume_multiple %3, 128 : i32
    %c0_3 = arith.constant 0 : index
    %5 = arith.index_cast %4 : i32 to index
    %6 = vector.load %arg3[%c0_3, %5] : memref<1x256xf32, #tpu.memory_space<vmem>>, vector<1x128xf32>
    %7 = vector.broadcast %6 : vector<1x128xf32> to vector<2x128xf32>
    %8 = arith.addf %2, %7 : vector<2x128xf32>
    %c0_4 = arith.constant 0 : index
    %c0_5 = arith.constant 0 : index
    %9 = vector.load %arg4[%c0_4, %c0_5] : memref<2x128xf32, #tpu.memory_space<vmem>>, vector<2x128xf32>
    tpu.vector_store %arg4[%c0_4, %c0_5], %8 {strides = array<i32>} : memref<2x128xf32, #tpu.memory_space<vmem>>, vector<2x128xf32>,
    return
  }
  func.func @transform_0(%arg0: i32) -> (i32, i32) {
    %c0_i32 = arith.constant 0 : i32
    %c0_i32_0 = arith.constant 0 : i32
    %c0_i32_1 = arith.constant 0 : i32
    return %c0_i32, %c0_i32_0 : i32, i32
  }
  func.func @transform_1(%arg0: i32) -> (i32, i32) {
    %c0_i32 = arith.constant 0 : i32
    %c0_i32_0 = arith.constant 0 : i32
    return %c0_i32, %arg0 : i32, i32
  }
  func.func @transform_2(%arg0: i32) -> (i32, i32) {
    %c0_i32 = arith.constant 0 : i32
    %c0_i32_0 = arith.constant 0 : i32
    %c0_i32_1 = arith.constant 0 : i32
    return %c0_i32, %c0_i32_0 : i32, i32
  }
  func.func @transform_3(%arg0: i32) -> (i32, i32) {
    %c0_i32 = arith.constant 0 : i32
    %c0_i32_0 = arith.constant 0 : i32
    return %c0_i32, %arg0 : i32, i32
  }
}

</mosaic_0001>

<bundles_post_ra>
// kernel: head_forward.1
= control target key start
LH: loop header
LB: loop body
LE: loop exit
PB: predicated region body
PF: predicated region fallthrough
CT: control target
= control target key end

     0   :  { %8 = vsyncpa [#allocation3], 0  ;;  %s702_s0 = inlined_call_operand.hbm [shape: f32[2,32], index: 0, kind: input, shape index: {}]   ;;  %s703_s1 = inlined_call_operand.hbm [shape: f32[32,256], index: 1, kind: input, shape index: {}]   ;;  %s704_s2 = inlined_call_operand.hbm [shape: f32[1,256], index: 2, kind: input, shape index: {}]   ;;  %s705_s3 = inlined_call_operand.vmem [shape: f32[2,256], index: 3, kind: output, shape index: {}]  }
   0x1   :  { %9 = vsyncpa [#allocation5], 0 }
   0x2   :  { %11 = vsyncpa [#allocation5 + $0x1], 0  ;;  %s583_s12 = smov 0   ;;  %s585_s13 = smov 0  }
   0x3   :  { %s587_s14 = smov 0   ;;  %s589_s15 = smov 0  }
   0x4 LB: > { %s602_s16 = sadd.s32 4294967295, %s556_s15   ;;  %s605_s17 = sadd.s32 1, %s556_s15   ;;  %s556_s15 = sphi %s589_s15, %s713_s15   ;;  %s552_s14 = sphi %s587_s14, %s712_s14   ;;  %s548_s13 = sphi %s585_s13, %s711_s13   ;;  %s544_s12 = sphi %s583_s12, %s710_s12  }
   0x5   : > { %s42_s18 = ssub.s32 %s556_s15, %s605_s17  ;;  %s45_s19 = sadd.s32 1, %s552_s14 }
   0x6   : > { %p43_p0 = scmp.eq.s32.totalorder %s42_s18, 0  ;;  %p52_p1 = scmp.ne.s32.totalorder %s552_s14, %s548_s13 }
   0x7   : > { %p53_p2 = scmp.eq.s32.totalorder %s556_s15, 0  ;;  %p58_p3 = scmp.ne.s32.totalorder %s548_s13, %s544_s12 }
   0x8   : > { %s615_s20 = scalar_select %p43_p0, %s552_s14, %s45_s19  }
   0x9   : > { %p617_p4 = por %p53_p2, %p52_p1  ;;  %p59_p5 = scmp.eq.s32.totalorder %s602_s16, 0 }
   0xa   : > { %p345_p6 = scmp.ge.s32.totalorder %s556_s15, 1  ;;  %p116_p7 = scmp.lt.s32.totalorder %s556_s15, 3 }
   0xb   : > { %p626_p8 = por %p59_p5, %p58_p3  ;;  %s140_s26 = sshll.u32 %s704_s2, 4  ;;  %s141_s26 = int_to_ptr.hbm [resolvable:$true] %s140_s26 }
   0xc   : > { %p630_p9 = pnand %p345_p6, %p116_p7  ;;  %s558_s27 = smov [#allocation6]  }
   0xd   : > { %s142_s28 = sshll.u32 %s558_s27, 4  ;;  %p383_p12 = scmp.lt.s32.totalorder %s556_s15, 2  ;;  %s143_s28 = int_to_ptr.vmem [resolvable:$true] %s142_s28 }
   0xe   : > { %p370_p10 = pneg %p630_p9  ;;  %s128_s4 = sshll.u32 %s702_s0, 4  ;;  %s129_s4 = int_to_ptr.hbm [resolvable:$true] %s128_s4 }
   0xf   : > { %p647_p13 = pnand %p383_p12, %p617_p4  ;;  %s559_s6 = smov [#allocation2]  }
  0x10   : > { %p371_p11 = pnand %p370_p10, %p59_p5  ;;  %s130_s7 = sshll.u32 %s559_s6, 4  ;;  %s131_s7 = int_to_ptr.vmem [resolvable:$true] %s130_s7 }
  0x11   : > { %s153_s8 = sand.u32 1, %s556_s15   ;;  %s155_s9 = sand.u32 1, %s552_s14  }
  0x12   : > { %376 = dma.hbm_to_vmem [thread:$0]  (!%p371_p11), %s141_s26, 32, %s143_s28, [#allocation5]  }
  0x13   : > { %373 = dma.hbm_to_vmem [thread:$0]  (!%p371_p11), %s129_s4, 32, %s131_s7, [#allocation3]  }
  0x14   : > { %s350_s10 = sshll.u32 %s556_s15, 3  ;;  %s349_s11 = sshll.u32 %s155_s9, 5 }
  0x15   : > { %s161_s19 = scalar_lea.hbm %s703_s1, %s350_s10  ;;  %s157_s24 = scalar_lea.vmem [#allocation4], %s349_s11 }
  0x16   : > { %s162_s21 = sshll.u32 %s161_s19, 4  ;;  %s164_s25 = sshll.u32 %s157_s24, 4  ;;  %s163_s21 = int_to_ptr.hbm [resolvable:$true] %s162_s21  ;;  %s165_s25 = int_to_ptr.vmem [resolvable:$true] %s164_s25 }
  0x17   : > { %s154_s26 = scalar_lea.sflag [#allocation5], %s153_s8  ;;  %s484_s27 = sshra.s32 %s163_s21, 4  ;;  %s485_s27 = int_to_ptr.hbm [resolvable:$true] %s484_s27 }
  0x18   : > { %s486_s28 = scalar_lea.hbm %s485_s27, 32  ;;  %p488_p1 = pneg %p647_p13 }
  0x19   : > { %p487_p0 = scmp.ne.s32.totalorder %s485_s27, %s486_s28  ;;  %s491_s30 = scalar_lea.hbm %s703_s1, 64 }
  0x1a   : > { %p492_p4 = scmp.lt.s32.totalorder %s485_s27, %s703_s1  ;;  %p493_p6 = scmp.lt.s32.totalorder %s491_s30, %s486_s28 }
  0x1b   : > { %p489_p2 = pnand %p488_p1, %p487_p0 }
  0x1c   : > { %p494_p7 = por %p493_p6, %p492_p4 }
  0x1d   : > { %p490_p3 = pneg %p489_p2 }
  0x1f   : > { %p495_p10 = pnand %p494_p7, %p490_p3 }
  0x21   : > { %498 = shalt.err (!%p495_p10)
}
  0x22   : > { %s560_s7 = smov 256   ;;  %s561_s8 = smov 128  }
  0x23   : > { %s562_s9 = smov 8   ;;  %176 = sbr.rel (%p630_p9) target bundleno = 184 (0xb8), region = 32 }
  0x24   : > { %380 = dma.hbm_to_vmem [thread:$0]  (!%p647_p13), %s163_s21, 512, %s165_s25, %s154_s26, %s560_s7, %s561_s8, %s562_s9  }
  0x28   : > { %531 = dma.done.wait (%p59_p5), [#allocation3], 32  }
  0x29   : > { %533 = vsyncadd (%p59_p5), [#allocation3], 4294967264  ;;  %s183_s10 = sand.u32 1, %s602_s16   ;;  %s185_s11 = sand.u32 1, %s548_s13  }
  0x2a   : > { %s353_s12 = sshll.u32 %s185_s11, 5  ;;  %s184_s18 = scalar_lea.sflag [#allocation5], %s183_s10 }
  0x2b   : > { %s187_s19 = scalar_lea.vmem [#allocation4], %s353_s12 }
  0x2c   : > { %535 = dma.done.wait (%p626_p8), %s184_s18, 512  }
  0x2d   : > { %537 = vsyncadd (%p626_p8), %s184_s18, 4294966784 }
  0x2e   : > { %539 = dma.done.wait (%p59_p5), [#allocation5], 32  }
  0x2f   : > { %541 = vsyncadd (%p59_p5), [#allocation5], 4294967264  ;;  %s356_s23 = sshll.u32 %s602_s16, 7  ;;  %v223_v0 = vld [vmem:[%s187_s19 + $0x18] sm:$0xff]  ;;  %v222_v1 = vld [vmem:[%s187_s19 + $0x10] sm:$0xff]  ;;  %vm232_vm0 = vcmask 261120  }
  0x30   : > { %s225_s5 = sshra.s32 %s356_s23, 7  ;;  %248 = vmatpush.msra.mxu0 %v223_v0  ;;  %v221_v2 = vld [vmem:[%s187_s19 + $0x8] sm:$0xff]  ;;  %v220_v3 = vld [vmem:[%s187_s19] sm:$0xff]  ;;  %v219_v4 = vld [vmem:[#allocation2] sm:$0x3]  ;;  %p215_p8 = scmp.lt.s32.totalorder %s602_s16, 1 }
  0x31   : > { %s227_s21 = scalar_lea.vmem [#allocation6], %s225_s5 }
  0x32   : > { %249 = vmatpush.msra.mxu0 %v222_v1  ;;  %s715_s16 = smov (!%p215_p8, %s602_s16), 1  ;;  %v423_v5 = vld [vmem:[%s227_s21] ss:$0 sm:$0xff] }
  0x33   : > { %s355_s22 = sshll.u32 %s715_s16, 1 }
  0x34   : > { %250 = vmatpush.msra.mxu0 %v221_v2  ;;  %s218_s26 = scalar_lea.vmem %s705_s3, %s355_s22 }
  0x36   : > { %251 = vmatpush.msra.mxu0 %v220_v3 }
  0x37   : > { %357 = vmatmul.msk.f32.vlgmr.msra.gmra.mxu0 %vm232_vm0, %v219_v4 }
  0xb4   : > { %v253_v6 = vpop.f32.mrf.mxu0 }
  0xb5   : > { %v254_v7 = vadd.f32 %v423_v5, %v253_v6 }
  0xb7   : > { %256 = vst [vmem:[%s218_s26] sm:$0x3] %v254_v7 }
  0xb8 PF: > { %p14_p5 = scmp.ge.s32.totalorder %s605_s17, 4   ;;  %s710_s12 = smov %s548_s13 }
  0xb9   : > { %s711_s13 = smov %s552_s14  ;;  %s712_s14 = smov %s615_s20 }
  0xba   : > { %s713_s15 = smov %s605_s17  ;;  %16 = sbr.rel (!%p14_p5) target bundleno = 4 (0x4), region = 82 }
  0xbf   :  { %276 = vsyncpa [#allocation3], 1 }
  0xc0   :  { %278 = vsyncpa [#allocation3 + $0x1], 1 }
  0xc1   :  { %279 = vsyncpa [#allocation5], 1 }
  0xc2   :  { %281 = vsyncpa [#allocation5 + $0x1], 1 }

</bundles_post_ra>
